<compile_context>
chip_gen: v5e
topology: v5e:2x2
jax: 0.10.0
libtpu: 0.0.40
codegen_flags: <defaults>
</compile_context>

<pallas_src>
import functools
import math

import jax
import jax.numpy as jnp
from jax import lax
from jax.experimental import pallas as pl
from jax.experimental.pallas import tpu as pltpu


_TARGET_BLOCK_BYTES = 4 << 20   # target per-block VMEM footprint (tile-padded)
_VMEM_LIMIT_CAP = 32 << 20      # safe scoped-VMEM request on v5e / v6e / v7x


# ----------------------------------------------------------------------------
# Buffer construction (deterministic, mirrors nn.Module.__init__)
# ----------------------------------------------------------------------------
def make_positional_encoding(emb_dim: int, max_len: int = 5000) -> jnp.ndarray:
    """pe buffer of shape (max_len, 1, emb_dim), exactly like the torch module."""
    assert emb_dim % 2 == 0, "emb_dim must be even (same as the PyTorch recipe)"
    position = jnp.arange(0, max_len, dtype=jnp.float32)[:, None]            # (max_len, 1)
    div_term = jnp.exp(
        jnp.arange(0, emb_dim, 2, dtype=jnp.float32) * (-math.log(10000.0) / emb_dim)
    )                                                                         # (emb_dim/2,)
    pe = jnp.zeros((max_len, emb_dim), dtype=jnp.float32)
    pe = pe.at[:, 0::2].set(jnp.sin(position * div_term))
    pe = pe.at[:, 1::2].set(jnp.cos(position * div_term))
    return pe[:, None, :]                                                     # (max_len, 1, emb_dim)


# ----------------------------------------------------------------------------
# Small helpers
# ----------------------------------------------------------------------------
def _round_up(x: int, m: int) -> int:
    return (x + m - 1) // m * m


def _num_tensorcores_per_device() -> int:
    """Heuristic: megacore-style chips (v4/v5p/v7x) expose 2 TCs per device."""
    try:
        kind = jax.devices()[0].device_kind.lower()
    except Exception:
        return 1
    if "lite" in kind or "v5e" in kind or "v6e" in kind:
        return 1
    if any(tok in kind for tok in ("v4", "v5p", "v7", "7x")):
        return 2
    if "v5" in kind:          # bare "TPU v5" == v5p
        return 2
    return 1


def _choose_seq_tile(seq_len: int, padded_row_bytes: int, num_tc: int) -> int:
    """Sequence rows per grid step: ~4 MiB padded-VMEM blocks, and on 2-TC chips
    a grid-step count that is a multiple of the core count (balanced tiles)."""
    ts = max(1, _TARGET_BLOCK_BYTES // max(padded_row_bytes, 1))
    ts = min(ts, seq_len)
    if num_tc >= 2 and seq_len > 1:
        nsteps = max(num_tc, pl.cdiv(seq_len, ts))
        nsteps = pl.cdiv(nsteps, num_tc) * num_tc
        ts = pl.cdiv(seq_len, nsteps)
    if 8 <= ts < seq_len:
        ts = (ts // 8) * 8     # keep the outer dim tidy (not required for legality)
    return int(max(1, min(ts, seq_len)))


def _splitmix32(x):
    x = x ^ (x >> jnp.uint32(16))
    x = x * jnp.uint32(0x7FEB352D)
    x = x ^ (x >> jnp.uint32(15))
    x = x * jnp.uint32(0x846CA68B)
    x = x ^ (x >> jnp.uint32(16))
    return x


# ----------------------------------------------------------------------------
# Kernels
# ----------------------------------------------------------------------------
def _pe_eval_kernel(x_ref, pe_ref, o_ref):
    # x_ref/o_ref: (ts, Bv, Dv); pe_ref: (ts, 1, Dv).
    # The add broadcasts pe over the batch (sublane) axis -- no lane concat.
    o_ref[...] = x_ref[...] + pe_ref[...]


def _pe_train_kernel(seed_ref, x_ref, pe_ref, o_ref, *, seq_tile, p):
    y = x_ref[...] + pe_ref[...]                       # (ts, Bv, Dv)
    shape = y.shape
    bv, dv = shape[1], shape[2]

    # Counter-based RNG: splitmix32 over the global flat element index.
    # TODO(synk): dropout RNG stream is not bit-identical to torch.nn.Dropout;
    # Bernoulli keep-mask + 1/(1-p) scaling semantics are preserved.
    row0 = (pl.program_id(0) * seq_tile).astype(jnp.uint32)
    rows = lax.broadcasted_iota(jnp.int32, shape, 0).astype(jnp.uint32) + row0
    ctr = rows * jnp.uint32((bv * dv) & 0xFFFFFFFF)
    if bv > 1:
        ctr = ctr + (lax.broadcasted_iota(jnp.int32, shape, 1).astype(jnp.uint32)
                     * jnp.uint32(dv))
    ctr = ctr + lax.broadcasted_iota(jnp.int32, shape, 2).astype(jnp.uint32)
    seed = seed_ref[0].astype(jnp.uint32)
    bits = _splitmix32(ctr * jnp.uint32(0x9E3779B1) + seed * jnp.uint32(0x85EBCA77))

    # Inverted dropout via integer threshold: P(drop) = thr / 2^32 ~= p.
    thr = jnp.uint32(min(0xFFFFFFFF, int(p * 4294967296.0)))
    keep = bits >= thr
    scale = jnp.asarray(1.0 / (1.0 - p), dtype=y.dtype)
    o_ref[...] = jnp.where(keep, y * scale, jnp.zeros_like(y))


# ----------------------------------------------------------------------------
# Wrapper
# ----------------------------------------------------------------------------
def position_encoder_forward(x, pe, *, p: float = 0.1, training: bool = False,
                             seed: int = 0, donate_x: bool = False):
    """x: (S, B, D); pe: (max_len, 1, D) (or (max_len, D)).  Returns (S, B, D)."""
    S, B, D = x.shape
    if not (0.0 <= p < 1.0):
        raise ValueError(f"dropout p must be in [0, 1), got {p}")
    pe3 = pe if pe.ndim == 3 else pe[:, None, :]
    assert pe3.shape[0] >= S and pe3.shape[1] == 1 and pe3.shape[2] == D
    # TODO(synk): torch promotes bf16 x + f32 pe to f32; here the add runs in x.dtype.
    pe_s = pe3[:S].astype(x.dtype)                     # (S, 1, D), cast once

    itemsize = int(jnp.dtype(x.dtype).itemsize)
    sub = max(8, 32 // max(itemsize, 1))               # sublane tile for this dtype

    # Lane-dense fallback for narrow emb_dim: present x as (S, 1, B*D) and widen
    # pe across the batch once in the wrapper (small-D regime, replicated-pe HBM
    # read is negligible there).  Otherwise keep the 3-D broadcast layout.
    use_flat = (D % 128 != 0) and (_round_up(B * D, 128) * itemsize * 8 <= _TARGET_BLOCK_BYTES)
    if use_flat:
        Bv, Dv = 1, B * D
        xv = x.reshape(S, 1, Dv)
        pev = jnp.tile(pe_s, (1, 1, B))                # (S, 1, B*D)
    else:
        Bv, Dv = B, D
        xv, pev = x, pe_s

    num_tc = _num_tensorcores_per_device()
    padded_row = _round_up(Bv, sub) * _round_up(Dv, 128) * itemsize
    pe_row = sub * _round_up(Dv, 128) * itemsize
    ts = _choose_seq_tile(S, padded_row, num_tc)

    # Double-buffered x-in + out + pe blocks; only raise the scoped-VMEM limit
    # when the default would actually be tight.
    # TODO(synk): rows wider than the VMEM budget (huge B*D) would need a second
    # grid axis over D; not needed for realistic caption shapes.
    vmem_need = 2 * (2 * ts * padded_row + ts * pe_row)
    vmem_limit = None
    if vmem_need > (12 << 20):
        vmem_limit = min(_VMEM_LIMIT_CAP, int(vmem_need * 1.25) + (2 << 20))

    grid = (pl.cdiv(S, ts),)
    out_shape = jax.ShapeDtypeStruct((S, Bv, Dv), x.dtype)
    cparams = pltpu.CompilerParams(dimension_semantics=("parallel",),
                                   vmem_limit_bytes=vmem_limit)
    cost = pl.CostEstimate(
        flops=S * B * D,
        transcendentals=0,
        bytes_accessed=(S * Bv * Dv * 2 + S * 1 * Dv) * itemsize,
    )

    use_dropout = training and p > 0.0
    if not use_dropout:
        out = pl.pallas_call(
            _pe_eval_kernel,
            out_shape=out_shape,
            grid=grid,
            in_specs=[pl.BlockSpec((ts, Bv, Dv), lambda s: (s, 0, 0)),
                      pl.BlockSpec((ts, 1, Dv), lambda s: (s, 0, 0))],
            out_specs=pl.BlockSpec((ts, Bv, Dv), lambda s: (s, 0, 0)),
            compiler_params=cparams,
            cost_estimate=cost,
            input_output_aliases={0: 0} if donate_x else {},
        )(xv, pev)
    else:
        seed_arr = jnp.atleast_1d(jnp.asarray(seed, dtype=jnp.int32))
        out = pl.pallas_call(
            functools.partial(_pe_train_kernel, seq_tile=ts, p=float(p)),
            out_shape=out_shape,
            grid_spec=pltpu.PrefetchScalarGridSpec(
                num_scalar_prefetch=1,
                grid=grid,
                in_specs=[pl.BlockSpec((ts, Bv, Dv), lambda s, seed_ref: (s, 0, 0)),
                          pl.BlockSpec((ts, 1, Dv), lambda s, seed_ref: (s, 0, 0))],
                out_specs=pl.BlockSpec((ts, Bv, Dv), lambda s, seed_ref: (s, 0, 0)),
            ),
            compiler_params=cparams,
            cost_estimate=cost,
            input_output_aliases={1: 0} if donate_x else {},
        )(seed_arr, xv, pev)

    return out if (Bv, Dv) == (B, D) else out.reshape(S, B, D)


# ----------------------------------------------------------------------------
# Demo / self-check
# ----------------------------------------------------------------------------
if __name__ == "__main__":
    DROPOUT_P = 0.1

    def _check(S, B, D, max_len, key):
        x = jax.random.normal(key, (S, B, D), dtype=jnp.float32)
        pe = make_positional_encoding(D, max_len=max_len)          # (max_len, 1, D)
        ref = x + pe[:S]

        # Eval mode (dropout is identity, matching module.eval()).
        out = jax.block_until_ready(
            position_encoder_forward(x, pe, p=DROPOUT_P, training=False))
        assert out.shape == (S, B, D)
        assert jnp.allclose(out, ref, atol=1e-6, rtol=1e-6)

        # Training mode: every element is either dropped (0) or scaled by 1/(1-p).
        out_tr = jax.block_until_ready(
            position_encoder_forward(x, pe, p=DROPOUT_P, training=True, seed=1234))
        assert out_tr.shape == (S, B, D)
        scaled = ref * jnp.float32(1.0 / (1.0 - DROPOUT_P))
        ok = (jnp.isclose(out_tr, 0.0, atol=1e-6)
              | jnp.isclose(out_tr, scaled, rtol=1e-5, atol=1e-5))
        assert bool(jnp.all(ok))
        drop_frac = float(jnp.mean(jnp.isclose(out_tr, 0.0, atol=1e-6)))
        assert 0.02 <= drop_frac <= 0.3, f"unexpected drop fraction {drop_frac}"

    key = jax.random.PRNGKey(0)
    k1, k2 = jax.random.split(key)
    _check(16, 2, 128, 64, k1)   # main 3-D broadcast path (D % 128 == 0)
    _check(8, 2, 32, 64, k2)     # lane-dense fallback path (D < 128)

    print("KERNEL_OK")
</pallas_src>

<mosaic_0001>
module attributes {stable_mosaic.version = 11 : i64} {
  func.func @_pe_eval_kernel(%arg0: i32, %arg1: memref<16x2x128xf32, #tpu.memory_space<vmem>>, %arg2: memref<16x1x128xf32, #tpu.memory_space<vmem>>, %arg3: memref<16x2x128xf32, #tpu.memory_space<vmem>>) attributes {dimension_semantics = [#tpu.dimension_semantics<parallel>], iteration_bounds = array<i64: 1>, scalar_prefetch = 0 : i64, scratch_operands = 0 : i64, tpu.core_type = #tpu.core_type<tc>, window_params = [{transform_indices = @transform_0, window_bounds = array<i64: 16, 2, 128>}, {transform_indices = @transform_1, window_bounds = array<i64: 16, 1, 128>}, {transform_indices = @transform_2, window_bounds = array<i64: 16, 2, 128>}]} {
    %c0 = arith.constant 0 : index
    %c0_0 = arith.constant 0 : index
    %c0_1 = arith.constant 0 : index
    %0 = vector.load %arg1[%c0, %c0_0, %c0_1] : memref<16x2x128xf32, #tpu.memory_space<vmem>>, vector<16x2x128xf32>
    %c0_2 = arith.constant 0 : index
    %c0_3 = arith.constant 0 : index
    %c0_4 = arith.constant 0 : index
    %1 = vector.load %arg2[%c0_2, %c0_3, %c0_4] : memref<16x1x128xf32, #tpu.memory_space<vmem>>, vector<16x1x128xf32>
    %2 = vector.broadcast %1 : vector<16x1x128xf32> to vector<16x2x128xf32>
    %3 = arith.addf %0, %2 : vector<16x2x128xf32>
    %c0_5 = arith.constant 0 : index
    %c0_6 = arith.constant 0 : index
    %c0_7 = arith.constant 0 : index
    %4 = vector.load %arg3[%c0_5, %c0_6, %c0_7] : memref<16x2x128xf32, #tpu.memory_space<vmem>>, vector<16x2x128xf32>
    tpu.vector_store %arg3[%c0_5, %c0_6, %c0_7], %3 {strides = array<i32>} : memref<16x2x128xf32, #tpu.memory_space<vmem>>, vector<16x2x128xf32>,
    return
  }
  func.func @transform_0(%arg0: i32) -> (i32, i32, i32) {
    %c0_i32 = arith.constant 0 : i32
    %c0_i32_0 = arith.constant 0 : i32
    %c0_i32_1 = arith.constant 0 : i32
    return %arg0, %c0_i32, %c0_i32_0 : i32, i32, i32
  }
  func.func @transform_1(%arg0: i32) -> (i32, i32, i32) {
    %c0_i32 = arith.constant 0 : i32
    %c0_i32_0 = arith.constant 0 : i32
    %c0_i32_1 = arith.constant 0 : i32
    return %arg0, %c0_i32, %c0_i32_0 : i32, i32, i32
  }
  func.func @transform_2(%arg0: i32) -> (i32, i32, i32) {
    %c0_i32 = arith.constant 0 : i32
    %c0_i32_0 = arith.constant 0 : i32
    %c0_i32_1 = arith.constant 0 : i32
    return %arg0, %c0_i32, %c0_i32_0 : i32, i32, i32
  }
}

</mosaic_0001>

<bundles_post_ra>
// kernel: tpu_custom_call.1
= control target key start
LH: loop header
LB: loop body
LE: loop exit
PB: predicated region body
PF: predicated region fallthrough
CT: control target
= control target key end

     0   :  { %7 = vsyncpa [#allocation3], 0  ;;  %s321_s0 = inlined_call_operand.hbm [shape: f32[16,2,128], index: 0, kind: input, shape index: {}]   ;;  %s322_s1 = inlined_call_operand.hbm [shape: f32[16,1,128], index: 1, kind: input, shape index: {}]   ;;  %s323_s2 = inlined_call_operand.hbm [shape: f32[16,2,128], index: 2, kind: output, shape index: {}]  }
   0x1   :  { %8 = vsyncpa [#allocation6], 0 }
   0x2   :  { %9 = vsyncpa [#allocation4], 0  ;;  %s14_s11 = sshll.u32 %s321_s0, 4  ;;  %s277_s12 = smov [#allocation2]   ;;  %s15_s11 = int_to_ptr.hbm [resolvable:$true] %s14_s11 }
   0x3   :  { %s16_s13 = sshll.u32 %s277_s12, 4  ;;  %s27_s16 = sshll.u32 %s322_s1, 4  ;;  %s17_s13 = int_to_ptr.vmem [resolvable:$true] %s16_s13  ;;  %s28_s16 = int_to_ptr.hbm [resolvable:$true] %s27_s16 }
   0x4   :  { %s278_s17 = smov 32   ;;  %s279_s18 = smov 2  }
   0x5   :  { %22 = dma.hbm_to_vmem [thread:$0]  %s15_s11, 512, %s17_s13, [#allocation3], %s278_s17, %s278_s17, %s279_s18  }
   0x6   :  { %s280_s19 = smov [#allocation5]   ;;  %s281_s21 = smov 16  }
   0x7   :  { %s29_s20 = sshll.u32 %s280_s19, 4  ;;  %s282_s0 = smov 1   ;;  %s30_s20 = int_to_ptr.vmem [resolvable:$true] %s29_s20 }
   0x8   :  { %35 = dma.hbm_to_vmem [thread:$0]  %s28_s16, 256, %s30_s20, [#allocation6], %s281_s21, %s281_s21, %s282_s0  }
   0x9   :  { %271 = dma.done.wait [#allocation3], 512  }
   0xa   :  { %272 = vsyncadd [#allocation3], 4294966784 }
   0xb   :  { %273 = dma.done.wait [#allocation6], 256  }
   0xc   :  { %274 = vsyncadd [#allocation6], 4294967040  ;;  %s283_s22 = smov [#allocation7]   ;;  %s162_s25 = sshll.u32 %s323_s2, 4  ;;  %v44_v0 = vld [vmem:[#allocation2] sm:$0x3]  ;;  %s163_s25 = int_to_ptr.hbm [resolvable:$true] %s162_s25 }
   0xd   :  { %s308_s23 = sshll.u32 %s283_s22, 4  ;;  %v183_v1 = vld [vmem:[#allocation5] ss:$0 sm:$0xff]  ;;  %v45_v2 = vld [vmem:[#allocation2 + $0x2] sm:$0x3]  ;;  %s161_s23 = int_to_ptr.vmem [resolvable:$true] %s308_s23 }
   0xe   :  { %v184_v3 = vld [vmem:[#allocation5 + $0x1] ss:$0 sm:$0xff]  ;;  %v124_v4 = vadd.f32 %v183_v1, %v44_v0  ;;  %v46_v5 = vld [vmem:[#allocation2 + $0x4] sm:$0x3]  ;;  %v185_v6 = vld [vmem:[#allocation5 + $0x2] ss:$0 sm:$0xff] }
   0xf   :  { %v125_v7 = vadd.f32 %v184_v3, %v45_v2  ;;  %v47_v8 = vld [vmem:[#allocation2 + $0x6] sm:$0x3]  ;;  %v186_v9 = vld [vmem:[#allocation5 + $0x3] ss:$0 sm:$0xff]  ;;  %v126_v10 = vadd.f32 %v185_v6, %v46_v5  ;;  %v48_v11 = vld [vmem:[#allocation2 + $0x8] sm:$0x3] }
  0x10   :  { %140 = vst [vmem:[#allocation7] sm:$0x3] %v124_v4  ;;  %v127_v12 = vadd.f32 %v186_v9, %v47_v8  ;;  %v187_v13 = vld [vmem:[#allocation5 + $0x4] ss:$0 sm:$0xff]  ;;  %v49_v14 = vld [vmem:[#allocation2 + $0xa] sm:$0x3] }
  0x11   :  { %141 = vst [vmem:[#allocation7 + $0x2] sm:$0x3] %v125_v7  ;;  %v188_v15 = vld [vmem:[#allocation5 + $0x5] ss:$0 sm:$0xff]  ;;  %v128_v16 = vadd.f32 %v187_v13, %v48_v11  ;;  %v50_v17 = vld [vmem:[#allocation2 + $0xc] sm:$0x3] }
  0x12   :  { %142 = vst [vmem:[#allocation7 + $0x4] sm:$0x3] %v126_v10  ;;  %v129_v18 = vadd.f32 %v188_v15, %v49_v14  ;;  %v189_v19 = vld [vmem:[#allocation5 + $0x6] ss:$0 sm:$0xff]  ;;  %v51_v20 = vld [vmem:[#allocation2 + $0xe] sm:$0x3] }
  0x13   :  { %143 = vst [vmem:[#allocation7 + $0x6] sm:$0x3] %v127_v12  ;;  %v190_v21 = vld [vmem:[#allocation5 + $0x7] ss:$0 sm:$0xff]  ;;  %v52_v22 = vld [vmem:[#allocation2 + $0x10] sm:$0x3]  ;;  %v130_v23 = vadd.f32 %v189_v19, %v50_v17 }
  0x14   :  { %144 = vst [vmem:[#allocation7 + $0x8] sm:$0x3] %v128_v16  ;;  %v191_v24 = vld [vmem:[#allocation5 + $0x8] ss:$0 sm:$0xff]  ;;  %v131_v25 = vadd.f32 %v190_v21, %v51_v20  ;;  %v53_v26 = vld [vmem:[#allocation2 + $0x12] sm:$0x3] }
  0x15   :  { %145 = vst [vmem:[#allocation7 + $0xa] sm:$0x3] %v129_v18  ;;  %v192_v27 = vld [vmem:[#allocation5 + $0x9] ss:$0 sm:$0xff]  ;;  %v132_v28 = vadd.f32 %v191_v24, %v52_v22  ;;  %v54_v29 = vld [vmem:[#allocation2 + $0x14] sm:$0x3] }
  0x16   :  { %146 = vst [vmem:[#allocation7 + $0xc] sm:$0x3] %v130_v23  ;;  %v133_v30 = vadd.f32 %v192_v27, %v53_v26  ;;  %v193_v31 = vld [vmem:[#allocation5 + $0xa] ss:$0 sm:$0xff]  ;;  %v55_v32 = vld [vmem:[#allocation2 + $0x16] sm:$0x3] }
  0x17   :  { %147 = vst [vmem:[#allocation7 + $0xe] sm:$0x3] %v131_v25  ;;  %v194_v33 = vld [vmem:[#allocation5 + $0xb] ss:$0 sm:$0xff]  ;;  %v134_v34 = vadd.f32 %v193_v31, %v54_v29  ;;  %v56_v35 = vld [vmem:[#allocation2 + $0x18] sm:$0x3] }
  0x18   :  { %148 = vst [vmem:[#allocation7 + $0x10] sm:$0x3] %v132_v28  ;;  %v135_v36 = vadd.f32 %v194_v33, %v55_v32  ;;  %v195_v37 = vld [vmem:[#allocation5 + $0xc] ss:$0 sm:$0xff]  ;;  %v57_v38 = vld [vmem:[#allocation2 + $0x1a] sm:$0x3] }
  0x19   :  { %149 = vst [vmem:[#allocation7 + $0x12] sm:$0x3] %v133_v30  ;;  %v196_v39 = vld [vmem:[#allocation5 + $0xd] ss:$0 sm:$0xff]  ;;  %v58_v40 = vld [vmem:[#allocation2 + $0x1c] sm:$0x3]  ;;  %v136_v41 = vadd.f32 %v195_v37, %v56_v35 }
  0x1a   :  { %150 = vst [vmem:[#allocation7 + $0x14] sm:$0x3] %v134_v34  ;;  %v197_v42 = vld [vmem:[#allocation5 + $0xe] ss:$0 sm:$0xff]  ;;  %v137_v43 = vadd.f32 %v196_v39, %v57_v38  ;;  %v59_v44 = vld [vmem:[#allocation2 + $0x1e] sm:$0x3] }
  0x1b   :  { %151 = vst [vmem:[#allocation7 + $0x16] sm:$0x3] %v135_v36  ;;  %v198_v45 = vld [vmem:[#allocation5 + $0xf] ss:$0 sm:$0xff]  ;;  %v138_v46 = vadd.f32 %v197_v42, %v58_v40 }
  0x1c   :  { %152 = vst [vmem:[#allocation7 + $0x18] sm:$0x3] %v136_v41  ;;  %v139_v47 = vadd.f32 %v198_v45, %v59_v44 }
  0x1d   :  { %153 = vst [vmem:[#allocation7 + $0x1a] sm:$0x3] %v137_v43 }
  0x1e   :  { %154 = vst [vmem:[#allocation7 + $0x1c] sm:$0x3] %v138_v46 }
  0x1f   :  { %155 = vst [vmem:[#allocation7 + $0x1e] sm:$0x3] %v139_v47 }
  0x20   :  { %168 = dma.vmem_to_hbm [thread:$0]  %s161_s23, 512, %s163_s25, [#allocation4], %s278_s17, %s278_s17, %s279_s18  }
  0x21   :  { %275 = dma.done.wait [#allocation4], 512  }
  0x22   :  { %276 = vsyncadd [#allocation4], 4294966784 }
  0x23   :  { %173 = vsyncpa [#allocation3], 1 }
  0x24   :  { %174 = vsyncpa [#allocation6], 1 }
  0x25   :  { %175 = vsyncpa [#allocation4], 1 }

</bundles_post_ra>
